<compile_context>
chip_gen: v5e
topology: v5e:2x2
jax: 0.10.0
libtpu: 0.0.40
codegen_flags: <defaults>
</compile_context>

<pallas_src>
import functools

import jax
import jax.numpy as jnp
from jax import lax
from jax.experimental import pallas as pl
from jax.experimental.pallas import tpu as pltpu


def _attention_kernel(x_ref, mask_ref, wq_ref, wk_ref, wv_ref,
                      bq_ref, bk_ref, bv_ref, wp_ref, bp_ref,
                      o_ref, acc_ref, *, bblk: int, seq: int):
    """One grid step = (one batch block of `bblk` elements) x (one head)."""
    h = pl.program_id(1)
    T = seq
    rows = x_ref.shape[0]          # bblk * T
    D = wq_ref.shape[1]

    @pl.when(h == 0)
    def _():
        acc_ref[...] = jnp.zeros_like(acc_ref)

    x = x_ref[...]                 # (rows, C) bf16

    # Per-head projections: lane-contiguous (rows, D) straight from the MXU.
    # The 1/sqrt(D) scale is already folded into wq / bq by the wrapper.
    q = jnp.dot(x, wq_ref[...], preferred_element_type=jnp.float32) + bq_ref[...]
    k = jnp.dot(x, wk_ref[...], preferred_element_type=jnp.float32) + bk_ref[...]
    v = jnp.dot(x, wv_ref[...], preferred_element_type=jnp.float32) + bv_ref[...]

    qb = q.reshape(bblk, T, D).astype(jnp.bfloat16)
    kb = k.reshape(bblk, T, D).astype(jnp.bfloat16)
    vb = v.reshape(bblk, T, D).astype(jnp.bfloat16)

    # Scores: contract on D, batch over the batch-block dim -> (bblk, T, T) f32.
    s = lax.dot_general(qb, kb,
                        dimension_numbers=(((2,), (2,)), ((0,), (0,))),
                        preferred_element_type=jnp.float32)

    # Additive key-padding mask (finite -1e30: fully-masked rows give uniform attention
    # instead of the NaN that the -inf PyTorch reference would produce).
    neg = jnp.where(mask_ref[...] == 0,
                    jnp.float32(-1e30), jnp.float32(0.0))        # (bblk, 1, T)
    s = s + neg

    # Softmax over the key axis (f32).
    s = s - jnp.max(s, axis=-1, keepdims=True)
    p = jnp.exp(s)
    denom = jnp.sum(p, axis=-1, keepdims=True)
    inv = pl.reciprocal(denom, approx=True)      # EUP slot
    inv = inv * (2.0 - denom * inv)              # one Newton step -> f32 accuracy
    p = (p * inv).astype(jnp.bfloat16)

    # Weighted values: (bblk, T, T) @ (bblk, T, D) -> (bblk, T, D) f32.
    y = lax.dot_general(p, vb,
                        dimension_numbers=(((2,), (1,)), ((0,), (0,))),
                        preferred_element_type=jnp.float32)

    # Head merge folded into the output projection (no lane-offset scatter):
    # acc += y_h @ Wp_h, accumulated over the head grid axis.
    y2 = y.reshape(rows, D).astype(jnp.bfloat16)
    acc_ref[...] += jnp.dot(y2, wp_ref[...], preferred_element_type=jnp.float32)

    @pl.when(h == pl.num_programs(1) - 1)
    def _():
        o_ref[...] = (acc_ref[...] + bp_ref[...]).astype(o_ref.dtype)


def _tpu_budget():
    """(vmem_capacity_bytes, target_rows, prefer_multi_step) — generation aware."""
    vmem_cap = 128 << 20
    try:
        info = pltpu.get_tpu_info()
        vmem_cap = int(getattr(info, "vmem_capacity_bytes", vmem_cap))
    except Exception:
        pass
    small_vmem = vmem_cap <= (64 << 20)          # v7x-like: 64 MiB/TC, 2 TCs/chip
    target_rows = 256 if small_vmem else 1024    # v5e/v6e: bigger blocks amortize overhead
    return vmem_cap, target_rows, small_vmem


def _choose_batch_block(B: int, T: int, target_rows: int, prefer_multi_step: bool) -> int:
    """Largest legal divisor of B whose row block fits the target.

    Legality: rows = bblk*T must be a multiple of 8 or equal the full B*T dim.
    On 2-TC parts (prefer_multi_step) keep >=2 (ideally even) grid steps.
    """
    divisors = [d for d in range(1, B + 1) if B % d == 0]
    legal = [d for d in divisors if d == B or (d * T) % 8 == 0]
    fitting = [d for d in legal if d * T <= max(target_rows, T)] or [min(legal)]
    if prefer_multi_step:
        even_multi = [d for d in fitting if (B // d) >= 2 and (B // d) % 2 == 0]
        multi = [d for d in fitting if (B // d) >= 2]
        pool = even_multi or multi or fitting
    else:
        pool = fitting
    return max(pool)


def _vmem_limit_bytes(rows, bblk, T, C, D, vmem_cap):
    bf16, f32 = 2, 4
    lane_t = max(T, 128)
    need = 0
    need += 2 * rows * C * bf16                        # x block (double buffered)
    need += 2 * rows * C * f32                         # out block
    need += 2 * bblk * 8 * lane_t * 4                  # mask block (padded)
    need += 2 * (3 * C * D + D * C) * bf16             # per-head weights
    need += 2 * (3 * 8 * max(D, 128) + 8 * C) * f32    # biases (padded)
    need += rows * C * f32                             # acc scratch
    need += 3 * rows * max(D, 128) * (f32 + bf16)      # q/k/v live (f32 + bf16 copies)
    need += 3 * bblk * T * lane_t * f32                # scores / probs / y live
    need += rows * C * f32                             # projection partial
    limit = 2 * need + (16 << 20)
    return int(min(max(limit, 32 << 20), int(0.8 * vmem_cap)))


def attention_pallas(x, mask, params, n_head: int):
    """x: (B, T, C) f32, mask: (B, T) int32 (1 = keep, 0 = mask key position)."""
    B, T, C = x.shape
    H = n_head
    D = C // H
    wq, bq, wk, bk, wv, bv, wp, bp = params
    scale = 1.0 / jnp.sqrt(jnp.float32(D))

    # Per-head weight layout (done once, outside the kernel):
    #   Wq/Wk/Wv: (C, C) -> (H, C, D)   (head column blocks)
    #   Wp      : (C, C) -> (H, D, C)   (head row blocks, merged by accumulation)
    def per_head_in(w):
        return jnp.transpose(w.reshape(C, H, D), (1, 0, 2))

    wq_h = (per_head_in(wq) * scale).astype(jnp.bfloat16)   # fold 1/sqrt(D) into Q
    wk_h = per_head_in(wk).astype(jnp.bfloat16)
    wv_h = per_head_in(wv).astype(jnp.bfloat16)
    wp_h = wp.reshape(H, D, C).astype(jnp.bfloat16)

    bq_h = (bq.reshape(H, 1, D) * scale).astype(jnp.float32)
    bk_h = bk.reshape(H, 1, D).astype(jnp.float32)
    bv_h = bv.reshape(H, 1, D).astype(jnp.float32)
    bp2 = bp.reshape(1, C).astype(jnp.float32)

    vmem_cap, target_rows, prefer_multi = _tpu_budget()
    bblk = _choose_batch_block(B, T, target_rows, prefer_multi)
    rows = bblk * T
    nb = B // bblk
    grid = (nb, H)

    # Flatten (B, T) into the matmul M dimension; bf16 MXU operands (f32 accumulate).
    x2 = x.reshape(B * T, C).astype(jnp.bfloat16)
    mask3 = mask.reshape(B, 1, T).astype(jnp.int32)

    kernel = functools.partial(_attention_kernel, bblk=bblk, seq=T)

    out2 = pl.pallas_call(
        kernel,
        out_shape=jax.ShapeDtypeStruct((B * T, C), x.dtype),
        grid_spec=pltpu.PrefetchScalarGridSpec(
            num_scalar_prefetch=0,
            grid=grid,
            in_specs=[
                pl.BlockSpec((rows, C), lambda i, h: (i, 0)),        # x (flattened rows)
                pl.BlockSpec((bblk, 1, T), lambda i, h: (i, 0, 0)),  # key-padding mask
                pl.BlockSpec((None, C, D), lambda i, h: (h, 0, 0)),  # Wq head block
                pl.BlockSpec((None, C, D), lambda i, h: (h, 0, 0)),  # Wk head block
                pl.BlockSpec((None, C, D), lambda i, h: (h, 0, 0)),  # Wv head block
                pl.BlockSpec((None, 1, D), lambda i, h: (h, 0, 0)),  # bq head block
                pl.BlockSpec((None, 1, D), lambda i, h: (h, 0, 0)),  # bk head block
                pl.BlockSpec((None, 1, D), lambda i, h: (h, 0, 0)),  # bv head block
                pl.BlockSpec((None, D, C), lambda i, h: (h, 0, 0)),  # Wp head block
                pl.BlockSpec((1, C), lambda i, h: (0, 0)),           # bp
            ],
            out_specs=pl.BlockSpec((rows, C), lambda i, h: (i, 0)),
            scratch_shapes=[pltpu.VMEM((rows, C), jnp.float32)],     # head accumulator
        ),
        compiler_params=pltpu.CompilerParams(
            dimension_semantics=("parallel", "arbitrary"),
            vmem_limit_bytes=_vmem_limit_bytes(rows, bblk, T, C, D, vmem_cap),
        ),
    )(x2, mask3, wq_h, wk_h, wv_h, bq_h, bk_h, bv_h, wp_h, bp2)

    return out2.reshape(B, T, C)


def _reference(x, mask, params, n_head):
    """Pure-JAX f32 reference mirroring the PyTorch forward (eval mode)."""
    wq, bq, wk, bk, wv, bv, wp, bp = params
    B, T, C = x.shape
    D = C // n_head

    def split(z):  # (B,T,C) -> (B,H,T,D)
        return z.reshape(B, T, n_head, D).transpose(0, 2, 1, 3)

    q = split(x @ wq + bq)
    k = split(x @ wk + bk)
    v = split(x @ wv + bv)
    att = (q @ jnp.swapaxes(k, -2, -1)) * (1.0 / jnp.sqrt(jnp.float32(D)))
    att = jnp.where(mask[:, None, None, :] == 0, -jnp.inf, att)
    att = jax.nn.softmax(att, axis=-1)
    y = (att @ v).transpose(0, 2, 1, 3).reshape(B, T, C)
    return y @ wp + bp


def init_params(key, n_embd):
    """Deterministic nn.Linear-style init: U(-1/sqrt(C), 1/sqrt(C))."""
    bound = 1.0 / jnp.sqrt(jnp.float32(n_embd))
    ks = jax.random.split(key, 8)
    params = []
    for i in range(4):  # query, key, value, proj
        w = jax.random.uniform(ks[2 * i], (n_embd, n_embd), jnp.float32, -bound, bound)
        b = jax.random.uniform(ks[2 * i + 1], (1, n_embd), jnp.float32, -bound, bound)
        params += [w, b]
    return tuple(params)


if __name__ == "__main__":
    B, T, C, n_head = 2, 8, 32, 4

    root = jax.random.PRNGKey(0)
    k_x, k_p = jax.random.split(root)

    x = jax.random.normal(k_x, (B, T, C), jnp.float32)
    # mask: keep all positions in batch 0, mask the last 2 key positions in batch 1.
    mask = jnp.ones((B, T), jnp.int32).at[1, -2:].set(0)

    params = init_params(k_p, C)

    out = attention_pallas(x, mask, params, n_head)
    out = jax.block_until_ready(out)

    ref = _reference(x, mask, params, n_head)
    assert out.shape == (B, T, C)
    # bf16 MXU operands (f32 accumulation) vs. a pure-f32 reference -> looser tolerance.
    assert jnp.allclose(out, ref, atol=2e-2, rtol=2e-2), "mismatch vs pure-JAX reference"

    print("KERNEL_OK")
</pallas_src>

<mosaic_0001>
module attributes {stable_mosaic.version = 11 : i64} {
  func.func @_attention_kernel(%arg0: i32, %arg1: i32, %arg2: memref<16x32xbf16, #tpu.memory_space<vmem>>, %arg3: memref<2x1x8xi32, #tpu.memory_space<vmem>>, %arg4: memref<1x32x8xbf16, #tpu.memory_space<vmem>>, %arg5: memref<1x32x8xbf16, #tpu.memory_space<vmem>>, %arg6: memref<1x32x8xbf16, #tpu.memory_space<vmem>>, %arg7: memref<1x1x8xf32, #tpu.memory_space<vmem>>, %arg8: memref<1x1x8xf32, #tpu.memory_space<vmem>>, %arg9: memref<1x1x8xf32, #tpu.memory_space<vmem>>, %arg10: memref<1x8x32xbf16, #tpu.memory_space<vmem>>, %arg11: memref<1x32xf32, #tpu.memory_space<vmem>>, %arg12: memref<16x32xf32, #tpu.memory_space<vmem>>, %arg13: memref<16x32xf32, #tpu.memory_space<vmem>>) attributes {dimension_semantics = [#tpu.dimension_semantics<parallel>, #tpu.dimension_semantics<arbitrary>], iteration_bounds = array<i64: 1, 4>, scalar_prefetch = 0 : i64, scratch_operands = 1 : i64, tpu.core_type = #tpu.core_type<tc>, window_params = [{transform_indices = @transform_0, window_bounds = array<i64: 16, 32>}, {transform_indices = @transform_1, window_bounds = array<i64: 2, 1, 8>}, {transform_indices = @transform_2, window_bounds = array<i64: 1, 32, 8>}, {transform_indices = @transform_3, window_bounds = array<i64: 1, 32, 8>}, {transform_indices = @transform_4, window_bounds = array<i64: 1, 32, 8>}, {transform_indices = @transform_5, window_bounds = array<i64: 1, 1, 8>}, {transform_indices = @transform_6, window_bounds = array<i64: 1, 1, 8>}, {transform_indices = @transform_7, window_bounds = array<i64: 1, 1, 8>}, {transform_indices = @transform_8, window_bounds = array<i64: 1, 8, 32>}, {pipeline_mode = #tpu.pipeline_mode<synchronous>, transform_indices = @transform_9, window_bounds = array<i64: 1, 32>}, {transform_indices = @transform_10, window_bounds = array<i64: 16, 32>}]} {
    %c0_i32 = arith.constant 0 : i32
    %0 = arith.cmpi eq, %arg1, %c0_i32 : i32
    %1 = arith.extui %0 : i1 to i32
    %c0_i32_0 = arith.constant 0 : i32
    %2 = arith.cmpi ne, %1, %c0_i32_0 : i32
    scf.if %2 {
      %cst_42 = arith.constant 0.000000e+00 : f32
      %67 = vector.broadcast %cst_42 : f32 to vector<16x32xf32>
      %c0_43 = arith.constant 0 : index
      %c0_44 = arith.constant 0 : index
      %68 = vector.load %arg13[%c0_43, %c0_44] : memref<16x32xf32, #tpu.memory_space<vmem>>, vector<16x32xf32>
      tpu.vector_store %arg13[%c0_43, %c0_44], %67 {strides = array<i32>} : memref<16x32xf32, #tpu.memory_space<vmem>>, vector<16x32xf32>,
    } else {
    }
    %c0 = arith.constant 0 : index
    %c0_1 = arith.constant 0 : index
    %3 = vector.load %arg2[%c0, %c0_1] : memref<16x32xbf16, #tpu.memory_space<vmem>>, vector<16x32xbf16>
    %c0_2 = arith.constant 0 : index
    %c0_3 = arith.constant 0 : index
    %c0_4 = arith.constant 0 : index
    %4 = vector.load %arg4[%c0_2, %c0_3, %c0_4] : memref<1x32x8xbf16, #tpu.memory_space<vmem>>, vector<1x32x8xbf16>
    %5 = vector.shape_cast %4 : vector<1x32x8xbf16> to vector<32x8xbf16>
    %cst = arith.constant dense<0.000000e+00> : vector<16x8xf32>
    %6 = tpu.matmul %3, %5, %cst {dimension_numbers = #tpu.dot_dimension_numbers<[1], [0], [0], [1], [0, 0, 1, 1], [], []>} : vector<16x32xbf16>, vector<32x8xbf16>, vector<16x8xf32> -> vector<16x8xf32>
    %c0_5 = arith.constant 0 : index
    %c0_6 = arith.constant 0 : index
    %c0_7 = arith.constant 0 : index
    %7 = vector.load %arg7[%c0_5, %c0_6, %c0_7] : memref<1x1x8xf32, #tpu.memory_space<vmem>>, vector<1x1x8xf32>
    %8 = vector.shape_cast %7 : vector<1x1x8xf32> to vector<1x8xf32>
    %9 = vector.broadcast %8 : vector<1x8xf32> to vector<16x8xf32>
    %10 = arith.addf %6, %9 : vector<16x8xf32>
    %c0_8 = arith.constant 0 : index
    %c0_9 = arith.constant 0 : index
    %c0_10 = arith.constant 0 : index
    %11 = vector.load %arg5[%c0_8, %c0_9, %c0_10] : memref<1x32x8xbf16, #tpu.memory_space<vmem>>, vector<1x32x8xbf16>
    %12 = vector.shape_cast %11 : vector<1x32x8xbf16> to vector<32x8xbf16>
    %cst_11 = arith.constant dense<0.000000e+00> : vector<16x8xf32>
    %13 = tpu.matmul %3, %12, %cst_11 {dimension_numbers = #tpu.dot_dimension_numbers<[1], [0], [0], [1], [0, 0, 1, 1], [], []>} : vector<16x32xbf16>, vector<32x8xbf16>, vector<16x8xf32> -> vector<16x8xf32>
    %c0_12 = arith.constant 0 : index
    %c0_13 = arith.constant 0 : index
    %c0_14 = arith.constant 0 : index
    %14 = vector.load %arg8[%c0_12, %c0_13, %c0_14] : memref<1x1x8xf32, #tpu.memory_space<vmem>>, vector<1x1x8xf32>
    %15 = vector.shape_cast %14 : vector<1x1x8xf32> to vector<1x8xf32>
    %16 = vector.broadcast %15 : vector<1x8xf32> to vector<16x8xf32>
    %17 = arith.addf %13, %16 : vector<16x8xf32>
    %c0_15 = arith.constant 0 : index
    %c0_16 = arith.constant 0 : index
    %c0_17 = arith.constant 0 : index
    %18 = vector.load %arg6[%c0_15, %c0_16, %c0_17] : memref<1x32x8xbf16, #tpu.memory_space<vmem>>, vector<1x32x8xbf16>
    %19 = vector.shape_cast %18 : vector<1x32x8xbf16> to vector<32x8xbf16>
    %cst_18 = arith.constant dense<0.000000e+00> : vector<16x8xf32>
    %20 = tpu.matmul %3, %19, %cst_18 {dimension_numbers = #tpu.dot_dimension_numbers<[1], [0], [0], [1], [0, 0, 1, 1], [], []>} : vector<16x32xbf16>, vector<32x8xbf16>, vector<16x8xf32> -> vector<16x8xf32>
    %c0_19 = arith.constant 0 : index
    %c0_20 = arith.constant 0 : index
    %c0_21 = arith.constant 0 : index
    %21 = vector.load %arg9[%c0_19, %c0_20, %c0_21] : memref<1x1x8xf32, #tpu.memory_space<vmem>>, vector<1x1x8xf32>
    %22 = vector.shape_cast %21 : vector<1x1x8xf32> to vector<1x8xf32>
    %23 = vector.broadcast %22 : vector<1x8xf32> to vector<16x8xf32>
    %24 = arith.addf %20, %23 : vector<16x8xf32>
    %25 = vector.shape_cast %10 : vector<16x8xf32> to vector<2x8x8xf32>
    %26 = arith.truncf %25 : vector<2x8x8xf32> to vector<2x8x8xbf16>
    %27 = vector.shape_cast %17 : vector<16x8xf32> to vector<2x8x8xf32>
    %28 = arith.truncf %27 : vector<2x8x8xf32> to vector<2x8x8xbf16>
    %29 = vector.shape_cast %24 : vector<16x8xf32> to vector<2x8x8xf32>
    %30 = arith.truncf %29 : vector<2x8x8xf32> to vector<2x8x8xbf16>
    %cst_22 = arith.constant dense<0.000000e+00> : vector<2x8x8xf32>
    %31 = tpu.matmul %26, %28, %cst_22 {dimension_numbers = #tpu.dot_dimension_numbers<[2], [2], [1], [1], [0, 0, 0, 1, 1, 1], [0], [0]>} : vector<2x8x8xbf16>, vector<2x8x8xbf16>, vector<2x8x8xf32> -> vector<2x8x8xf32>
    %c0_23 = arith.constant 0 : index
    %c0_24 = arith.constant 0 : index
    %c0_25 = arith.constant 0 : index
    %32 = vector.load %arg3[%c0_23, %c0_24, %c0_25] : memref<2x1x8xi32, #tpu.memory_space<vmem>>, vector<2x1x8xi32>
    %c0_i32_26 = arith.constant 0 : i32
    %33 = vector.broadcast %c0_i32_26 : i32 to vector<2x1x8xi32>
    %34 = arith.cmpi eq, %32, %33 : vector<2x1x8xi32>
    %cst_27 = arith.constant -1.000000e+30 : f32
    %cst_28 = arith.constant 0.000000e+00 : f32
    %35 = vector.broadcast %cst_27 : f32 to vector<2x1x8xf32>
    %36 = vector.broadcast %cst_28 : f32 to vector<2x1x8xf32>
    %37 = arith.select %34, %35, %36 : vector<2x1x8xi1>, vector<2x1x8xf32>
    %38 = vector.broadcast %37 : vector<2x1x8xf32> to vector<2x8x8xf32>
    %39 = arith.addf %31, %38 : vector<2x8x8xf32>
    %cst_29 = arith.constant dense<0xFF800000> : vector<2x8xf32>
    %40 = vector.multi_reduction <maximumf>, %39, %cst_29 [2] : vector<2x8x8xf32> to vector<2x8xf32>
    %41 = vector.shape_cast %40 : vector<2x8xf32> to vector<2x8x1xf32>
    %42 = vector.broadcast %41 : vector<2x8x1xf32> to vector<2x8x8xf32>
    %43 = arith.subf %39, %42 : vector<2x8x8xf32>
    %44 = math.exp %43 : vector<2x8x8xf32>
    %cst_30 = arith.constant dense<0.000000e+00> : vector<2x8xf32>
    %45 = vector.multi_reduction <add>, %44, %cst_30 [2] : vector<2x8x8xf32> to vector<2x8xf32>
    %46 = vector.shape_cast %45 : vector<2x8xf32> to vector<2x8x1xf32>
    %47 = tpu.reciprocal %46 {approx = true} : vector<2x8x1xf32> -> vector<2x8x1xf32>
    %48 = arith.mulf %46, %47 : vector<2x8x1xf32>
    %cst_31 = arith.constant 2.000000e+00 : f32
    %49 = vector.broadcast %cst_31 : f32 to vector<2x8x1xf32>
    %50 = arith.subf %49, %48 : vector<2x8x1xf32>
    %51 = arith.mulf %47, %50 : vector<2x8x1xf32>
    %52 = vector.broadcast %51 : vector<2x8x1xf32> to vector<2x8x8xf32>
    %53 = arith.mulf %44, %52 : vector<2x8x8xf32>
    %54 = arith.truncf %53 : vector<2x8x8xf32> to vector<2x8x8xbf16>
    %cst_32 = arith.constant dense<0.000000e+00> : vector<2x8x8xf32>
    %55 = tpu.matmul %54, %30, %cst_32 {dimension_numbers = #tpu.dot_dimension_numbers<[2], [1], [1], [2], [0, 0, 0, 1, 1, 2], [0], [0]>} : vector<2x8x8xbf16>, vector<2x8x8xbf16>, vector<2x8x8xf32> -> vector<2x8x8xf32>
    %56 = vector.shape_cast %55 : vector<2x8x8xf32> to vector<16x8xf32>
    %57 = arith.truncf %56 : vector<16x8xf32> to vector<16x8xbf16>
    %c0_33 = arith.constant 0 : index
    %c0_34 = arith.constant 0 : index
    %58 = vector.load %arg13[%c0_33, %c0_34] : memref<16x32xf32, #tpu.memory_space<vmem>>, vector<16x32xf32>
    %c0_35 = arith.constant 0 : index
    %c0_36 = arith.constant 0 : index
    %c0_37 = arith.constant 0 : index
    %59 = vector.load %arg10[%c0_35, %c0_36, %c0_37] : memref<1x8x32xbf16, #tpu.memory_space<vmem>>, vector<1x8x32xbf16>
    %60 = vector.shape_cast %59 : vector<1x8x32xbf16> to vector<8x32xbf16>
    %cst_38 = arith.constant dense<0.000000e+00> : vector<16x32xf32>
    %61 = tpu.matmul %57, %60, %cst_38 {dimension_numbers = #tpu.dot_dimension_numbers<[1], [0], [0], [1], [0, 0, 1, 1], [], []>} : vector<16x8xbf16>, vector<8x32xbf16>, vector<16x32xf32> -> vector<16x32xf32>
    %62 = arith.addf %58, %61 : vector<16x32xf32>
    %c0_39 = arith.constant 0 : index
    %c0_40 = arith.constant 0 : index
    %63 = vector.load %arg13[%c0_39, %c0_40] : memref<16x32xf32, #tpu.memory_space<vmem>>, vector<16x32xf32>
    tpu.vector_store %arg13[%c0_39, %c0_40], %62 {strides = array<i32>} : memref<16x32xf32, #tpu.memory_space<vmem>>, vector<16x32xf32>,
    %c3_i32 = arith.constant 3 : i32
    %64 = arith.cmpi eq, %arg1, %c3_i32 : i32
    %65 = arith.extui %64 : i1 to i32
    %c0_i32_41 = arith.constant 0 : i32
    %66 = arith.cmpi ne, %65, %c0_i32_41 : i32
    scf.if %66 {
      %c0_42 = arith.constant 0 : index
      %c0_43 = arith.constant 0 : index
      %67 = vector.load %arg13[%c0_42, %c0_43] : memref<16x32xf32, #tpu.memory_space<vmem>>, vector<16x32xf32>
      %c0_44 = arith.constant 0 : index
      %c0_45 = arith.constant 0 : index
      %68 = vector.load %arg11[%c0_44, %c0_45] : memref<1x32xf32, #tpu.memory_space<vmem>>, vector<1x32xf32>
      %69 = vector.broadcast %68 : vector<1x32xf32> to vector<16x32xf32>
      %70 = arith.addf %67, %69 : vector<16x32xf32>
      %c0_46 = arith.constant 0 : index
      %c0_47 = arith.constant 0 : index
      %71 = vector.load %arg12[%c0_46, %c0_47] : memref<16x32xf32, #tpu.memory_space<vmem>>, vector<16x32xf32>
      tpu.vector_store %arg12[%c0_46, %c0_47], %70 {strides = array<i32>} : memref<16x32xf32, #tpu.memory_space<vmem>>, vector<16x32xf32>,
    } else {
    }
    return
  }
  func.func @transform_0(%arg0: i32, %arg1: i32) -> (i32, i32) {
    %c0_i32 = arith.constant 0 : i32
    %c0_i32_0 = arith.constant 0 : i32
    return %arg0, %c0_i32 : i32, i32
  }
  func.func @transform_1(%arg0: i32, %arg1: i32) -> (i32, i32, i32) {
    %c0_i32 = arith.constant 0 : i32
    %c0_i32_0 = arith.constant 0 : i32
    %c0_i32_1 = arith.constant 0 : i32
    return %arg0, %c0_i32, %c0_i32_0 : i32, i32, i32
  }
  func.func @transform_2(%arg0: i32, %arg1: i32) -> (i32, i32, i32) {
    %c0_i32 = arith.constant 0 : i32
    %c0_i32_0 = arith.constant 0 : i32
    %c0_i32_1 = arith.constant 0 : i32
    return %arg1, %c0_i32, %c0_i32_0 : i32, i32, i32
  }
  func.func @transform_3(%arg0: i32, %arg1: i32) -> (i32, i32, i32) {
    %c0_i32 = arith.constant 0 : i32
    %c0_i32_0 = arith.constant 0 : i32
    %c0_i32_1 = arith.constant 0 : i32
    return %arg1, %c0_i32, %c0_i32_0 : i32, i32, i32
  }
  func.func @transform_4(%arg0: i32, %arg1: i32) -> (i32, i32, i32) {
    %c0_i32 = arith.constant 0 : i32
    %c0_i32_0 = arith.constant 0 : i32
    %c0_i32_1 = arith.constant 0 : i32
    return %arg1, %c0_i32, %c0_i32_0 : i32, i32, i32
  }
  func.func @transform_5(%arg0: i32, %arg1: i32) -> (i32, i32, i32) {
    %c0_i32 = arith.constant 0 : i32
    %c0_i32_0 = arith.constant 0 : i32
    %c0_i32_1 = arith.constant 0 : i32
    return %arg1, %c0_i32, %c0_i32_0 : i32, i32, i32
  }
  func.func @transform_6(%arg0: i32, %arg1: i32) -> (i32, i32, i32) {
    %c0_i32 = arith.constant 0 : i32
    %c0_i32_0 = arith.constant 0 : i32
    %c0_i32_1 = arith.constant 0 : i32
    return %arg1, %c0_i32, %c0_i32_0 : i32, i32, i32
  }
  func.func @transform_7(%arg0: i32, %arg1: i32) -> (i32, i32, i32) {
    %c0_i32 = arith.constant 0 : i32
    %c0_i32_0 = arith.constant 0 : i32
    %c0_i32_1 = arith.constant 0 : i32
    return %arg1, %c0_i32, %c0_i32_0 : i32, i32, i32
  }
  func.func @transform_8(%arg0: i32, %arg1: i32) -> (i32, i32, i32) {
    %c0_i32 = arith.constant 0 : i32
    %c0_i32_0 = arith.constant 0 : i32
    %c0_i32_1 = arith.constant 0 : i32
    return %arg1, %c0_i32, %c0_i32_0 : i32, i32, i32
  }
  func.func @transform_9(%arg0: i32, %arg1: i32) -> (i32, i32) {
    %c0_i32 = arith.constant 0 : i32
    %c0_i32_0 = arith.constant 0 : i32
    %c0_i32_1 = arith.constant 0 : i32
    return %c0_i32, %c0_i32_0 : i32, i32
  }
  func.func @transform_10(%arg0: i32, %arg1: i32) -> (i32, i32) {
    %c0_i32 = arith.constant 0 : i32
    %c0_i32_0 = arith.constant 0 : i32
    return %arg0, %c0_i32 : i32, i32
  }
}

</mosaic_0001>

<bundles_post_ra>
// kernel: tpu_custom_call.1
= control target key start
LH: loop header
LB: loop body
LE: loop exit
PB: predicated region body
PF: predicated region fallthrough
CT: control target
= control target key end

     0   :  { %s1284_s0 = inlined_call_operand.vmem [shape: bf16[16,32], index: 0, kind: input, shape index: {}]   ;;  %s1285_s1 = inlined_call_operand.vmem [shape: s32[2,1,8], index: 1, kind: input, shape index: {}]   ;;  %s1286_s2 = inlined_call_operand.vmem [shape: bf16[4,32,8], index: 2, kind: input, shape index: {}]   ;;  %s1287_s3 = inlined_call_operand.vmem [shape: bf16[4,32,8], index: 3, kind: input, shape index: {}]   ;;  %s1288_s4 = inlined_call_operand.vmem [shape: bf16[4,32,8], index: 4, kind: input, shape index: {}]   ;;  %s1289_s5 = inlined_call_operand.vmem [shape: f32[4,1,8], index: 5, kind: input, shape index: {}]   ;;  %s1290_s6 = inlined_call_operand.vmem [shape: f32[4,1,8], index: 6, kind: input, shape index: {}]   ;;  %s1291_s7 = inlined_call_operand.vmem [shape: f32[4,1,8], index: 7, kind: input, shape index: {}]   ;;  %s1292_s8 = inlined_call_operand.vmem [shape: bf16[4,8,32], index: 8, kind: input, shape index: {}]   ;;  %s1293_s9 = inlined_call_operand.vmem [shape: f32[1,32], index: 9, kind: input, shape index: {}]   ;;  %s1294_s10 = inlined_call_operand.hbm [shape: f32[16,32], index: 10, kind: output, shape index: {}]  }
   0x1   :  { %1296 = sst [smem:[#allocation8_spill]] %s1286_s2 }
   0x2   :  { %1297 = sst [smem:[#allocation9_spill]] %s1289_s5 }
   0x3   :  { %15 = vsyncpa [#allocation4], 0  ;;  %s1175_s13 = smov 0   ;;  %s1177_s14 = smov 0  }
   0x4   :  { %s1179_s15 = smov 0  }
   0x5 LB: > { %1298 = sst [smem:[#allocation6_spill]] %s1109_s14  ;;  %s30_s17 = sadd.s32 1, %s1109_s14  ;;  %s1113_s15 = sphi %s1179_s15, %s21_s15   ;;  %s1109_s14 = sphi %s1177_s14, %s1304_s14   ;;  %s1105_s13 = sphi %s1175_s13, %s1303_s13  }
   0x6   : > { %p31_p0 = scmp.ge.s32.totalorder %s30_s17, 4  ;;  %p952_p1 = scmp.ge.s32.totalorder %s1113_s15, 1 }
   0x7   : > { %p399_p2 = scmp.lt.s32.totalorder %s1113_s15, 5 }
   0x8   : > { %s1306_s17 = smov (%p31_p0, %s30_s17), 0 }
   0x9   : > { %1299 = sst [smem:[#allocation7_spill]] %s1306_s17  ;;  %p400_p3 = pnand %p952_p1, %p399_p2 }
   0xa   : > { %p475_p4 = scmp.lt.s32.totalorder (!%p400_p3), %s1105_s13, 3  ;;  %s1300_s5 = sld [smem:[#allocation9_spill]] (!%p400_p3) }
   0xb   : > { %403 = sbr.rel (%p400_p3) target bundleno = 870 (0x366), region = 60  ;;  %s1301_s2 = sld [smem:[#allocation8_spill]] (!%p400_p3) }
   0xc   : > { %p960_p5 = scmp.ne.s32.totalorder (!%p400_p3), %s1105_s13, 0 }
  0x10   : > { %s1198_s18 = scalar_select %p475_p4, %s1105_s13, 3 }
  0x12   : > { %s1002_s19 = sshll.u32 %s1198_s18, 4  ;;  %s492_s22 = scalar_lea.vmem %s1300_s5, %s1198_s18 }
  0x13   : > { %s479_s25 = scalar_lea.vmem %s1301_s2, %s1002_s19  ;;  %s484_s28 = scalar_lea.vmem %s1287_s3, %s1002_s19 }
  0x14   : > { %s1214_s11 = scalar_lea.vmem %s1288_s4, %s1002_s19  ;;  %s495_s17 = scalar_lea.vmem %s1290_s6, %s1198_s18 }
  0x15   : > { %s498_s21 = scalar_lea.vmem %s1291_s7, %s1198_s18  ;;  %s959_s5 = sshll.u32 %s1198_s18, 2 }
  0x16   : > { %s1228_s2 = scalar_lea.vmem %s1292_s8, %s959_s5  ;;  %508 = sbr.rel (%p960_p5) target bundleno = 30 (0x1e), region = 64 }
  0x1b   : > { %vm509_vm0 = vcmask 261120   ;;  %v1115_v0 = vmov 0.0  }
  0x1c   : > { %510 = vst.msk [vmem:[#allocation2] sm:$0xff] %vm509_vm0, %v1115_v0 }
  0x1d   : > { %511 = vst.msk [vmem:[#allocation2 + $0x8] sm:$0xff] %vm509_vm0, %v1115_v0 }
  0x1e PF: > { %v1009_v1 = vld [vmem:[%s484_s28 + $0x8] sm:$0xff]  ;;  %v1008_v3 = vld [vmem:[%s484_s28] sm:$0xff]  ;;  %vm539_vm1 = vcmask 261120   ;;  %vm643_vm2 = vcmask 64512   ;;  %v1116_v26 = vmov 0.0   ;;  %vm715_vm5 = vcmask 1043456  }
  0x1f   : > { %v1007_v2 = vld [vmem:[%s479_s25 + $0x8] sm:$0xff]  ;;  %583 = vmatpush.bf16.msra.mxu1 %v1009_v1  ;;  %v1006_v4 = vld [vmem:[%s479_s25] sm:$0xff]  ;;  %p997_p6 = scmp.ne.s32.totalorder %s1105_s13, 3 }
  0x20   : > { %549 = vmatpush.bf16.msra.mxu0 %v1007_v2  ;;  %v1005_v5 = vld [vmem:[%s1284_s0] sm:$0xff]  ;;  %v1011_v22 = vld [vmem:[%s1214_s11 + $0x8] sm:$0xff] }
  0x21   : > { %v1047_v6 = vld [vmem:[%s495_s17] ss:$0 sm:$0xff]  ;;  %617 = vmatpush.bf16.msra.mxu2 %v1011_v22  ;;  %v632_v24 = vld [vmem:[%s1285_s1 + $0x1] sm:$0x1] }
  0x22   : > { %v1048_v9 = vld [vmem:[%s492_s22] ss:$0 sm:$0xff]  ;;  %vm634_vm3 = vcmp.eq.s32.totalorder %v632_v24, 0 }
  0x23   : > { %584 = vmatpush.bf16.msra.mxu1 %v1008_v3  ;;  %v1010_v23 = vld [vmem:[%s1214_s11] sm:$0xff]  ;;  %v636_v27 = vsel %vm634_vm3, -1e+30, %v1116_v26 }
  0x24   : > { %550 = vmatpush.bf16.msra.mxu0 %v1006_v4  ;;  %v631_v25 = vld [vmem:[%s1285_s1] sm:$0x1]  ;;  %v640_v28 = vperm.slane %v636_v27, 0 }
  0x25   : > { %618 = vmatpush.bf16.msra.mxu2 %v1010_v23  ;;  %vm633_vm4 = vcmp.eq.s32.totalorder %v631_v25, 0  ;;  %v1049_v50 = vld [vmem:[%s498_s21] ss:$0 sm:$0xff] }
  0x26   : > { %982 = vmatmul.msk.bf16.vlgmr.msra.gmra.mxu1 %vm539_vm1, %v1005_v5  ;;  %v635_v30 = vsel %vm633_vm4, -1e+30, %v1116_v26  ;;  %v754_v58 = vld [vmem:[%s1228_s2] sm:$0xf] }
  0x27   : > { %973 = vmatmul.msk.bf16.vlgmr.msra.gmra.mxu0 %vm539_vm1, %v1005_v5  ;;  %v639_v33 = vperm.slane %v635_v30, 0  ;;  %v759_v59 = vsel %vm715_vm5, %v754_v58, 0 }
  0x28   : > { %991 = vmatmul.msk.bf16.vlgmr.msra.gmra.mxu2 %vm539_vm1, %v1005_v5 }
  0xa3   : > { %v586_v7 = vpop.f32.mrf.mxu1 }
  0xa4   : > { %v587_v8 = vadd.f32 %v1047_v6, %v586_v7  ;;  %v552_v10 = vpop.f32.mrf.mxu0 }
  0xa5   : > { %v553_v13 = vadd.f32 %v1048_v9, %v552_v10 }
  0xa6   : > { %v627_v11 = vpack.c.bf16 %v587_v8, %v587_v8 }
  0xa7   : > { %v625_v15 = vpack.c.bf16 %v553_v13, %v553_v13 }
  0xa8   : > { %v648_v12 = vsel %vm643_vm2, %v627_v11, 0 }
  0xa9   : > { %657 = vmatpush.bf16.xpose.msra.mxu3 %v648_v12 }
  0xab   : > { %v588_v14 = vpop.f32.mrf.mxu1  ;;  %v620_v49 = vpop.f32.mrf.mxu2 }
  0xac   : > { %v589_v16 = vadd.f32 %v1047_v6, %v588_v14  ;;  %v554_v18 = vpop.f32.mrf.mxu0  ;;  %v621_v52 = vadd.f32 %v1049_v50, %v620_v49 }
  0xad   : > { %v555_v20 = vadd.f32 %v1048_v9, %v554_v18  ;;  %v753_v18 = vld [vmem:[#allocation2 + $0x8] sm:$0xff] }
  0xae   : > { %v628_v17 = vpack.c.bf16 %v589_v16, %v589_v16  ;;  %v629_v54 = vpack.c.bf16 %v621_v52, %v621_v52 }
  0xaf   : > { %v626_v21 = vpack.c.bf16 %v555_v20, %v555_v20 }
  0xb0   : > { %992 = vmatmul.msk.bf16.vlgmr.msra.gmra.mxu3 %vm643_vm2, %v625_v15  ;;  %v667_v19 = vsel %vm643_vm2, %v628_v17, 0  ;;  %v717_v56 = vsel %vm715_vm5, %v629_v54, 0  ;;  %v752_v15 = vld [vmem:[#allocation2] sm:$0xff] }
  0xb1   : > { %676 = vmatpush.bf16.xpose.msrb.mxu0 %v667_v19  ;;  %726 = vmatpush.bf16.msrb.mxu1 %v717_v56 }
  0xb2   : > { %768 = vmatpush.bf16.msrb.mxu3 %v759_v59 }
  0xb3   : > { %v622_v51 = vpop.f32.mrf.mxu2 }
  0xb4   : > { %v623_v53 = vadd.f32 %v1049_v50, %v622_v51 }
  0xb6   : > { %v630_v55 = vpack.c.bf16 %v623_v53, %v623_v53 }
  0xb8   : > { %993 = vmatmul.msk.bf16.vlgmr.msrb.gmra.mxu0 %vm643_vm2, %v626_v21  ;;  %v736_v57 = vsel %vm715_vm5, %v630_v55, 0 }
  0xb9   : > { %745 = vmatpush.bf16.msrb.mxu2 %v736_v57 }
 0x133   : > { %v659_v29 = vpop.f32.mrf.mxu3 }
 0x134   : > { %v660_v36 = vadd.f32 %v659_v29, %v639_v33 }
 0x135   : > { %v678_v31 = vpop.f32.mrf.mxu0 }
 0x136   : > { %v679_v32 = vadd.f32 %v678_v31, %v640_v28  ;;  %v682_v38 = vsel %vm643_vm2, %v660_v36, -inf }
 0x138   : > { %v685_v34 = vsel %vm643_vm2, %v679_v32, -inf }
 0x139   : > { %686 = vmax.xlane.f32.xlu0 %v685_v34 }
 0x13b   : > { %v661_v35 = vpop.f32.mrf.mxu3 }
 0x13d   : > { %v680_v37 = vpop.f32.mrf.mxu0 }
 0x141   : > { %683 = vmax.xlane.f32.xlu0 %v682_v38 }
 0x1ac   : > { %v687_v39 = vpop.xlane.xlu0 %686 }
 0x1ad   : > { %v689_v40 = vsub.f32 %v679_v32, %v687_v39 }
 0x1af   : > { %v692_v41 = vmul.f32 1.442695, %v689_v40 }
 0x1b1   : > { %1050 = vpow2.f32 %v692_v41 }
 0x1b4   : > { %v684_v42 = vpop.xlane.xlu0 %683 }
 0x1b5   : > { %v688_v43 = vsub.f32 %v660_v36, %v684_v42 }
 0x1b7   : > { %v1051_v44 = vpop.eup %1050  ;;  %v690_v45 = vmul.f32 1.442695, %v688_v43 }
 0x1b8   : > { %v697_v46 = vsel %vm643_vm2, %v1051_v44, 0.0 }
 0x1b9   : > { %1052 = vpow2.f32 %v690_v45  ;;  %698 = vadd.xlane.f32.xlu1 %v697_v46 }
 0x1bf   : > { %v1053_v47 = vpop.eup %1052 }
 0x1c0   : > { %v694_v48 = vsel %vm643_vm2, %v1053_v47, 0.0 }
 0x1c1   : > { %695 = vadd.xlane.f32.xlu1 %v694_v48 }
 0x22c   : > { %v699_v60 = vpop.xlane.xlu1 %698 }
 0x22d   : > { %1054 = vrcp.f32 %v699_v60 }
 0x233   : > { %v1055_v61 = vpop.eup %1054 }
 0x234   : > { %v703_v62 = vmul.f32 %v1055_v61, %v699_v60  ;;  %v696_v63 = vpop.xlane.xlu1 %695 }
 0x235   : > { %1056 = vrcp.f32 %v696_v63 }
 0x236   : > { %v705_v0 = vsub.f32 2.0, %v703_v62 }
 0x238   : > { %v707_v1 = vmul.f32 %v1055_v61, %v705_v0 }
 0x23a   : > { %v709_v2 = vmul.f32 %v1051_v44, %v707_v1 }
 0x23b   : > { %v1057_v3 = vpop.eup %1056 }
 0x23c   : > { %v711_v4 = vpack.c.bf16 %v709_v2, %v709_v2  ;;  %v702_v5 = vmul.f32 %v1057_v3, %v696_v63 }
 0x23e   : > { %v704_v6 = vsub.f32 2.0, %v702_v5  ;;  %995 = vmatmul.msk.bf16.vlgmr.msrb.gmra.mxu2 %vm643_vm2, %v711_v4 }
 0x240   : > { %v706_v7 = vmul.f32 %v1057_v3, %v704_v6 }
 0x242   : > { %v708_v8 = vmul.f32 %v1053_v47, %v706_v7 }
 0x244   : > { %v710_v9 = vpack.c.bf16 %v708_v8, %v708_v8 }
 0x246   : > { %994 = vmatmul.msk.bf16.vlgmr.msrb.gmra.mxu1 %vm643_vm2, %v710_v9 }
 0x2c1   : > { %v747_v10 = vpop.f32.mrf.mxu2 }
 0x2c3   : > { %v728_v11 = vpop.f32.mrf.mxu1 }
 0x2c4   : > { %v751_v12 = vpack.c.bf16 %v747_v10, %v728_v11 }
 0x2c6   : > { %996 = vmatmul.msk.bf16.vlgmr.msrb.gmra.mxu3 %vm643_vm2, %v751_v12 }
 0x2c9   : > { %v749_v13 = vpop.f32.mrf.mxu2 }
 0x2cb   : > { %v730_v14 = vpop.f32.mrf.mxu1 }
 0x349   : > { %v770_v16 = vpop.f32.mrf.mxu3 }
 0x34a   : > { %v775_v17 = vadd.f32 %v770_v16, %v752_v15 }
 0x34c   : > { %777 = vst.msk [vmem:[#allocation2] sm:$0xff] %vm539_vm1, %v775_v17 }
 0x350   : > { %782 = sbr.rel (%p997_p6) target bundleno = 863 (0x35f), region = 68 }
 0x351   : > { %v772_v19 = vpop.f32.mrf.mxu3 }
 0x352   : > { %v776_v20 = vadd.f32 %v772_v19, %v753_v18 }
 0x354   : > { %778 = vst.msk [vmem:[#allocation2 + $0x8] sm:$0xff] %vm539_vm1, %v776_v20 }
 0x355   : > { %v783_v21 = vld [vmem:[#allocation2] sm:$0xff] }
 0x356   : > { %v1058_v22 = vld [vmem:[%s1293_s9] ss:$0 sm:$0xff] }
 0x357   : > { %v789_v24 = vadd.f32 %v1058_v22, %v783_v21 }
 0x359   : > { %791 = vst.msk [vmem:[#allocation3] sm:$0xff] %vm539_vm1, %v789_v24 }
 0x35b   : > { %v784_v23 = vld [vmem:[#allocation2 + $0x8] sm:$0xff] }
 0x35c   : > { %v790_v25 = vadd.f32 %v1058_v22, %v784_v23 }
 0x35e   : > { %792 = vst.msk [vmem:[#allocation3 + $0x8] sm:$0xff] %vm539_vm1, %v790_v25 }
 0x35f PF: > { %s1302_s27 = sadd.s32 4294967295, %s1113_s15   ;;  %s803_s13 = sshll.u32 %s1294_s10, 4  ;;  %s804_s13 = int_to_ptr.hbm [resolvable:$true] %s803_s13 }
 0x360   : > { %p1016_p7 = scmp.eq.s32.totalorder %s1302_s27, 3  ;;  %s1117_s30 = smov [#allocation3]  }
 0x361   : > { %s801_s11 = sshll.u32 %s1117_s30, 4  ;;  %s1118_s12 = smov 128   ;;  %s802_s11 = int_to_ptr.vmem [resolvable:$true] %s801_s11 }
 0x362   : > { %s1119_s20 = smov 8  }
 0x363   : > { %1013 = dma.vmem_to_hbm [thread:$0]  (%p1016_p7), %s802_s11, 256, %s804_s13, [#allocation4], %s1118_s12, %s1118_s12, %s1119_s20  }
 0x364   : > { %1100 = dma.done.wait (%p1016_p7), [#allocation4], 256  }
 0x365   : > { %1102 = vsyncadd (%p1016_p7), [#allocation4], 4294967040 }
 0x366 PF: > { %s21_s15 = sadd.s32 1, %s1113_s15   ;;  %s1303_s13 = sld [smem:[#allocation6_spill]] }
 0x367   : > { %p18_p8 = scmp.ge.s32.totalorder %s21_s15, 6   ;;  %s1304_s14 = sld [smem:[#allocation7_spill]] }
 0x369   :  { %20 = sbr.rel (!%p18_p8) target bundleno = 5 (0x5), region = 120 }
 0x36e   :  { %820 = vsyncpa [#allocation4], 1 }
 0x36f   :  { %822 = vsyncpa [#allocation4 + $0x1], 1 }

</bundles_post_ra>
